<compile_context>
chip_gen: v5e
topology: v5e:2x2
jax: 0.10.0
libtpu: 0.0.40
codegen_flags: <defaults>
</compile_context>

<pallas_src>
import jax
import jax.numpy as jnp
from jax import lax
from jax.experimental import pallas as pl
from jax.experimental.pallas import tpu as pltpu


def _ceil_to(x: int, m: int) -> int:
    return ((x + m - 1) // m) * m


def _make_kernel(eps: float):
    def kernel(x_ref, w1_ref, b1_ref, g_ref, beta_ref, w2_ref, b2_ref,
               h_ref, logits_ref, h_acc):
        j = pl.program_id(1)  # vocab-tile index (inner, "arbitrary" axis)

        # ---- transform: dense + GELU + LayerNorm, computed once per row tile ----
        @pl.when(j == 0)
        def _():
            h = jnp.dot(x_ref[...], w1_ref[...],
                        preferred_element_type=jnp.float32)
            h = h + b1_ref[...]                              # (1, H) row-broadcast

            # exact (erf) GELU — PyTorch default activation
            h = 0.5 * h * (1.0 + lax.erf(h * 0.7071067811865476))

            # LayerNorm over last dim; single reduction sweep (sum & sum-of-squares)
            inv_h = 1.0 / h.shape[-1]
            s1 = jnp.sum(h, axis=-1, keepdims=True)
            s2 = jnp.sum(h * h, axis=-1, keepdims=True)
            mean = s1 * inv_h
            var = jnp.maximum(s2 * inv_h - mean * mean, 0.0)
            hn = (h - mean) * lax.rsqrt(var + eps)
            hn = hn * g_ref[...] + beta_ref[...]

            h_acc[...] = hn
            h_ref[...] = hn.astype(h_ref.dtype)

        # ---- decoder: logits tile for vocab block j (reuses cached transform) ----
        h = h_acc[...].astype(w2_ref.dtype)                  # bf16 into MXU when enabled
        logits = jnp.dot(h, w2_ref[...], preferred_element_type=jnp.float32)
        logits_ref[...] = (logits + b2_ref[...]).astype(logits_ref.dtype)

    return kernel


def bert_lm_prediction_head(x, w_dense, b_dense, ln_gamma, ln_beta,
                            w_decoder, decoder_bias, *,
                            eps=1e-12, tm=256, tn=2048,
                            compute_dtype=jnp.bfloat16):
    """x: [B, S, H]. Returns (transformed hidden [B,S,H], logits [B,S,V]) in f32."""
    B, S, H = x.shape
    V = w_decoder.shape[1]
    N = B * S

    # Row tile: 16-aligned (bf16 sublane pack), never larger than padded N.
    tm = max(16, min(_ceil_to(tm, 16), _ceil_to(N, 16)))
    N_pad = _ceil_to(N, tm)
    # Vocab tile: 128-lane aligned, never larger than padded V.
    tn = max(128, min(_ceil_to(tn, 128), _ceil_to(V, 128)))
    V_pad = _ceil_to(V, tn)

    # Operand preparation: MXU operands in compute_dtype; LN params / biases f32.
    x2 = x.reshape(N, H).astype(compute_dtype)
    if N_pad != N:
        x2 = jnp.pad(x2, ((0, N_pad - N), (0, 0)))
    w1 = w_dense.astype(compute_dtype)
    w2 = w_decoder.astype(compute_dtype)
    b2 = decoder_bias.astype(jnp.float32)
    if V_pad != V:
        w2 = jnp.pad(w2, ((0, 0), (0, V_pad - V)))
        b2 = jnp.pad(b2, ((0, V_pad - V),))
    b1 = b_dense.reshape(1, H).astype(jnp.float32)
    g = ln_gamma.reshape(1, H).astype(jnp.float32)
    bt = ln_beta.reshape(1, H).astype(jnp.float32)
    b2 = b2.reshape(1, V_pad)

    # VMEM budget: double-buffered tiles + resident weights + scratch.
    wb = jnp.dtype(compute_dtype).itemsize
    est = (2 * tm * H * wb          # x tile (double-buffered)
           + 2 * H * H * wb         # W_dense (resident; count 2x for safety)
           + 2 * H * tn * wb        # W_decoder column block (double-buffered)
           + 2 * tm * H * 4         # h output tile
           + 2 * tm * tn * 4        # logits output tile
           + tm * H * 4             # h scratch
           + 8 * (H + V_pad) * 4)   # biases / LN params (overestimate)
    vmem_limit = int(min(max(2 * est, 32 * 1024 * 1024), 60 * 1024 * 1024))

    kernel = _make_kernel(float(eps))

    h2, logits2 = pl.pallas_call(
        kernel,
        out_shape=(
            jax.ShapeDtypeStruct((N_pad, H), jnp.float32),
            jax.ShapeDtypeStruct((N_pad, V_pad), jnp.float32),
        ),
        grid_spec=pltpu.PrefetchScalarGridSpec(
            num_scalar_prefetch=0,
            grid=(N_pad // tm, V_pad // tn),
            in_specs=[
                pl.BlockSpec((tm, H), lambda i, j: (i, 0)),    # x row tile
                pl.BlockSpec((H, H), lambda i, j: (0, 0)),     # W_dense [in, out]
                pl.BlockSpec((1, H), lambda i, j: (0, 0)),     # b_dense
                pl.BlockSpec((1, H), lambda i, j: (0, 0)),     # LN gamma
                pl.BlockSpec((1, H), lambda i, j: (0, 0)),     # LN beta
                pl.BlockSpec((H, tn), lambda i, j: (0, j)),    # W_decoder col block
                pl.BlockSpec((1, tn), lambda i, j: (0, j)),    # decoder bias block
            ],
            out_specs=[
                pl.BlockSpec((tm, H), lambda i, j: (i, 0)),    # transformed hidden
                pl.BlockSpec((tm, tn), lambda i, j: (i, j)),   # mlm logits
            ],
            scratch_shapes=[pltpu.VMEM((tm, H), jnp.float32)],
        ),
        compiler_params=pltpu.CompilerParams(
            dimension_semantics=("parallel", "arbitrary"),
            vmem_limit_bytes=vmem_limit,
        ),
    )(x2, w1, b1, g, bt, w2, b2)

    h2 = h2[:N].reshape(B, S, H)
    logits2 = logits2[:N, :V].reshape(B, S, V)
    return h2, logits2


def _reference(x, w_dense, b_dense, ln_gamma, ln_beta, w_decoder, decoder_bias,
               eps=1e-12):
    h = jnp.einsum("bsh,hk->bsk", x, w_dense) + b_dense
    h = 0.5 * h * (1.0 + lax.erf(h / jnp.sqrt(2.0)))
    mean = jnp.mean(h, axis=-1, keepdims=True)
    var = jnp.mean((h - mean) ** 2, axis=-1, keepdims=True)
    h = (h - mean) * lax.rsqrt(var + eps) * ln_gamma + ln_beta
    logits = jnp.einsum("bsh,hv->bsv", h, w_decoder) + decoder_bias
    return h, logits


if __name__ == "__main__":
    key = jax.random.PRNGKey(0)

    def make_params(k, H, V):
        k_w1, k_b1, k_w2, k_b2 = jax.random.split(k, 4)
        w_dense = 0.02 * jax.random.normal(k_w1, (H, H), jnp.float32)   # [in, out]
        b_dense = 0.02 * jax.random.normal(k_b1, (H,), jnp.float32)
        ln_gamma = jnp.ones((H,), jnp.float32)
        ln_beta = jnp.zeros((H,), jnp.float32)
        w_decoder = 0.02 * jax.random.normal(k_w2, (H, V), jnp.float32)  # [in, out]
        decoder_bias = 0.01 * jax.random.normal(k_b2, (V,), jnp.float32)
        return w_dense, b_dense, ln_gamma, ln_beta, w_decoder, decoder_bias

    # --- case 1: aligned small shapes, f32 compute path (tight tolerance) ---
    B, S, H, V = 2, 8, 128, 256
    k0, k1 = jax.random.split(key)
    x = jax.random.normal(k0, (B, S, H), jnp.float32)
    params = make_params(k1, H, V)

    h_out, logits_out = bert_lm_prediction_head(
        x, *params, eps=1e-12, compute_dtype=jnp.float32)
    jax.block_until_ready((h_out, logits_out))
    h_ref, logits_ref = _reference(x, *params, eps=1e-12)
    assert jnp.allclose(h_out, h_ref, atol=1e-4, rtol=1e-4), "transform mismatch (f32)"
    assert jnp.allclose(logits_out, logits_ref, atol=1e-4, rtol=1e-4), "logits mismatch (f32)"

    # --- case 2: ragged N and V exercising row/vocab padding, f32 path ---
    B2, S2, H2, V2 = 3, 5, 128, 200
    k2, k3 = jax.random.split(k1)
    x_r = jax.random.normal(k2, (B2, S2, H2), jnp.float32)
    params_r = make_params(k3, H2, V2)
    h_r, logits_r = bert_lm_prediction_head(
        x_r, *params_r, eps=1e-12, compute_dtype=jnp.float32)
    jax.block_until_ready((h_r, logits_r))
    h_rr, logits_rr = _reference(x_r, *params_r, eps=1e-12)
    assert jnp.allclose(h_r, h_rr, atol=1e-4, rtol=1e-4), "transform mismatch (ragged)"
    assert jnp.allclose(logits_r, logits_rr, atol=1e-4, rtol=1e-4), "logits mismatch (ragged)"

    # --- case 3: bf16 MXU operands (production fast path), loose tolerance ---
    h_bf, logits_bf = bert_lm_prediction_head(
        x, *params, eps=1e-12, compute_dtype=jnp.bfloat16)
    jax.block_until_ready((h_bf, logits_bf))
    assert jnp.allclose(h_bf, h_ref, atol=1e-1, rtol=1e-1), "transform mismatch (bf16)"
    assert jnp.allclose(logits_bf, logits_ref, atol=1e-1, rtol=1e-1), "logits mismatch (bf16)"

    print("KERNEL_OK")
</pallas_src>

<mosaic_0001>
module attributes {stable_mosaic.version = 11 : i64} {
  func.func @kernel(%arg0: i32, %arg1: i32, %arg2: memref<16x128xf32, #tpu.memory_space<vmem>>, %arg3: memref<128x128xf32, #tpu.memory_space<vmem>>, %arg4: memref<1x128xf32, #tpu.memory_space<vmem>>, %arg5: memref<1x128xf32, #tpu.memory_space<vmem>>, %arg6: memref<1x128xf32, #tpu.memory_space<vmem>>, %arg7: memref<128x256xf32, #tpu.memory_space<vmem>>, %arg8: memref<1x256xf32, #tpu.memory_space<vmem>>, %arg9: memref<16x128xf32, #tpu.memory_space<vmem>>, %arg10: memref<16x256xf32, #tpu.memory_space<vmem>>, %arg11: memref<16x128xf32, #tpu.memory_space<vmem>>) attributes {dimension_semantics = [#tpu.dimension_semantics<parallel>, #tpu.dimension_semantics<arbitrary>], iteration_bounds = array<i64: 1, 1>, scalar_prefetch = 0 : i64, scratch_operands = 1 : i64, tpu.core_type = #tpu.core_type<tc>, window_params = [{transform_indices = @transform_0, window_bounds = array<i64: 16, 128>}, {pipeline_mode = #tpu.pipeline_mode<synchronous>, transform_indices = @transform_1, window_bounds = array<i64: 128, 128>}, {pipeline_mode = #tpu.pipeline_mode<synchronous>, transform_indices = @transform_2, window_bounds = array<i64: 1, 128>}, {pipeline_mode = #tpu.pipeline_mode<synchronous>, transform_indices = @transform_3, window_bounds = array<i64: 1, 128>}, {pipeline_mode = #tpu.pipeline_mode<synchronous>, transform_indices = @transform_4, window_bounds = array<i64: 1, 128>}, {transform_indices = @transform_5, window_bounds = array<i64: 128, 256>}, {transform_indices = @transform_6, window_bounds = array<i64: 1, 256>}, {transform_indices = @transform_7, window_bounds = array<i64: 16, 128>}, {transform_indices = @transform_8, window_bounds = array<i64: 16, 256>}]} {
    %c0_i32 = arith.constant 0 : i32
    %0 = arith.cmpi eq, %arg1, %c0_i32 : i32
    %1 = arith.extui %0 : i1 to i32
    %c0_i32_0 = arith.constant 0 : i32
    %2 = arith.cmpi ne, %1, %c0_i32_0 : i32
    scf.if %2 {
      %c0_8 = arith.constant 0 : index
      %c0_9 = arith.constant 0 : index
      %10 = vector.load %arg2[%c0_8, %c0_9] : memref<16x128xf32, #tpu.memory_space<vmem>>, vector<16x128xf32>
      %c0_10 = arith.constant 0 : index
      %c0_11 = arith.constant 0 : index
      %11 = vector.load %arg3[%c0_10, %c0_11] : memref<128x128xf32, #tpu.memory_space<vmem>>, vector<128x128xf32>
      %cst_12 = arith.constant dense<0.000000e+00> : vector<16x128xf32>
      %12 = tpu.matmul %10, %11, %cst_12 {dimension_numbers = #tpu.dot_dimension_numbers<[1], [0], [0], [1], [0, 0, 1, 1], [], []>} : vector<16x128xf32>, vector<128x128xf32>, vector<16x128xf32> -> vector<16x128xf32>
      %c0_13 = arith.constant 0 : index
      %c0_14 = arith.constant 0 : index
      %13 = vector.load %arg4[%c0_13, %c0_14] : memref<1x128xf32, #tpu.memory_space<vmem>>, vector<1x128xf32>
      %14 = vector.broadcast %13 : vector<1x128xf32> to vector<16x128xf32>
      %15 = arith.addf %12, %14 : vector<16x128xf32>
      %cst_15 = arith.constant 5.000000e-01 : f32
      %16 = vector.broadcast %cst_15 : f32 to vector<16x128xf32>
      %17 = arith.mulf %16, %15 : vector<16x128xf32>
      %cst_16 = arith.constant 0.707106769 : f32
      %18 = vector.broadcast %cst_16 : f32 to vector<16x128xf32>
      %19 = arith.mulf %15, %18 : vector<16x128xf32>
      %20 = math.erf %19 : vector<16x128xf32>
      %cst_17 = arith.constant 1.000000e+00 : f32
      %21 = vector.broadcast %cst_17 : f32 to vector<16x128xf32>
      %22 = arith.addf %21, %20 : vector<16x128xf32>
      %23 = arith.mulf %17, %22 : vector<16x128xf32>
      %cst_18 = arith.constant dense<0.000000e+00> : vector<16xf32>
      %24 = vector.multi_reduction <add>, %23, %cst_18 [1] : vector<16x128xf32> to vector<16xf32>
      %25 = vector.shape_cast %24 : vector<16xf32> to vector<16x1xf32>
      %26 = arith.mulf %23, %23 : vector<16x128xf32>
      %cst_19 = arith.constant dense<0.000000e+00> : vector<16xf32>
      %27 = vector.multi_reduction <add>, %26, %cst_19 [1] : vector<16x128xf32> to vector<16xf32>
      %28 = vector.shape_cast %27 : vector<16xf32> to vector<16x1xf32>
      %cst_20 = arith.constant 7.812500e-03 : f32
      %29 = vector.broadcast %cst_20 : f32 to vector<16x1xf32>
      %30 = arith.mulf %25, %29 : vector<16x1xf32>
      %cst_21 = arith.constant 7.812500e-03 : f32
      %31 = vector.broadcast %cst_21 : f32 to vector<16x1xf32>
      %32 = arith.mulf %28, %31 : vector<16x1xf32>
      %33 = arith.mulf %30, %30 : vector<16x1xf32>
      %34 = arith.subf %32, %33 : vector<16x1xf32>
      %cst_22 = arith.constant 0.000000e+00 : f32
      %35 = vector.broadcast %cst_22 : f32 to vector<16x1xf32>
      %36 = arith.maximumf %34, %35 : vector<16x1xf32>
      %37 = vector.broadcast %30 : vector<16x1xf32> to vector<16x128xf32>
      %38 = arith.subf %23, %37 : vector<16x128xf32>
      %cst_23 = arith.constant 9.99999996E-13 : f32
      %39 = vector.broadcast %cst_23 : f32 to vector<16x1xf32>
      %40 = arith.addf %36, %39 : vector<16x1xf32>
      %41 = math.rsqrt %40 : vector<16x1xf32>
      %42 = vector.broadcast %41 : vector<16x1xf32> to vector<16x128xf32>
      %43 = arith.mulf %38, %42 : vector<16x128xf32>
      %c0_24 = arith.constant 0 : index
      %c0_25 = arith.constant 0 : index
      %44 = vector.load %arg5[%c0_24, %c0_25] : memref<1x128xf32, #tpu.memory_space<vmem>>, vector<1x128xf32>
      %45 = vector.broadcast %44 : vector<1x128xf32> to vector<16x128xf32>
      %46 = arith.mulf %43, %45 : vector<16x128xf32>
      %c0_26 = arith.constant 0 : index
      %c0_27 = arith.constant 0 : index
      %47 = vector.load %arg6[%c0_26, %c0_27] : memref<1x128xf32, #tpu.memory_space<vmem>>, vector<1x128xf32>
      %48 = vector.broadcast %47 : vector<1x128xf32> to vector<16x128xf32>
      %49 = arith.addf %46, %48 : vector<16x128xf32>
      %c0_28 = arith.constant 0 : index
      %c0_29 = arith.constant 0 : index
      %50 = vector.load %arg11[%c0_28, %c0_29] : memref<16x128xf32, #tpu.memory_space<vmem>>, vector<16x128xf32>
      tpu.vector_store %arg11[%c0_28, %c0_29], %49 {strides = array<i32>} : memref<16x128xf32, #tpu.memory_space<vmem>>, vector<16x128xf32>,
      %c0_30 = arith.constant 0 : index
      %c0_31 = arith.constant 0 : index
      %51 = vector.load %arg9[%c0_30, %c0_31] : memref<16x128xf32, #tpu.memory_space<vmem>>, vector<16x128xf32>
      tpu.vector_store %arg9[%c0_30, %c0_31], %49 {strides = array<i32>} : memref<16x128xf32, #tpu.memory_space<vmem>>, vector<16x128xf32>,
    } else {
    }
    %c0 = arith.constant 0 : index
    %c0_1 = arith.constant 0 : index
    %3 = vector.load %arg11[%c0, %c0_1] : memref<16x128xf32, #tpu.memory_space<vmem>>, vector<16x128xf32>
    %c0_2 = arith.constant 0 : index
    %c0_3 = arith.constant 0 : index
    %4 = vector.load %arg7[%c0_2, %c0_3] : memref<128x256xf32, #tpu.memory_space<vmem>>, vector<128x256xf32>
    %cst = arith.constant dense<0.000000e+00> : vector<16x256xf32>
    %5 = tpu.matmul %3, %4, %cst {dimension_numbers = #tpu.dot_dimension_numbers<[1], [0], [0], [1], [0, 0, 1, 1], [], []>} : vector<16x128xf32>, vector<128x256xf32>, vector<16x256xf32> -> vector<16x256xf32>
    %c0_4 = arith.constant 0 : index
    %c0_5 = arith.constant 0 : index
    %6 = vector.load %arg8[%c0_4, %c0_5] : memref<1x256xf32, #tpu.memory_space<vmem>>, vector<1x256xf32>
    %7 = vector.broadcast %6 : vector<1x256xf32> to vector<16x256xf32>
    %8 = arith.addf %5, %7 : vector<16x256xf32>
    %c0_6 = arith.constant 0 : index
    %c0_7 = arith.constant 0 : index
    %9 = vector.load %arg10[%c0_6, %c0_7] : memref<16x256xf32, #tpu.memory_space<vmem>>, vector<16x256xf32>
    tpu.vector_store %arg10[%c0_6, %c0_7], %8 {strides = array<i32>} : memref<16x256xf32, #tpu.memory_space<vmem>>, vector<16x256xf32>,
    return
  }
  func.func @transform_0(%arg0: i32, %arg1: i32) -> (i32, i32) {
    %c0_i32 = arith.constant 0 : i32
    %c0_i32_0 = arith.constant 0 : i32
    return %arg0, %c0_i32 : i32, i32
  }
  func.func @transform_1(%arg0: i32, %arg1: i32) -> (i32, i32) {
    %c0_i32 = arith.constant 0 : i32
    %c0_i32_0 = arith.constant 0 : i32
    %c0_i32_1 = arith.constant 0 : i32
    return %c0_i32, %c0_i32_0 : i32, i32
  }
  func.func @transform_2(%arg0: i32, %arg1: i32) -> (i32, i32) {
    %c0_i32 = arith.constant 0 : i32
    %c0_i32_0 = arith.constant 0 : i32
    %c0_i32_1 = arith.constant 0 : i32
    return %c0_i32, %c0_i32_0 : i32, i32
  }
  func.func @transform_3(%arg0: i32, %arg1: i32) -> (i32, i32) {
    %c0_i32 = arith.constant 0 : i32
    %c0_i32_0 = arith.constant 0 : i32
    %c0_i32_1 = arith.constant 0 : i32
    return %c0_i32, %c0_i32_0 : i32, i32
  }
  func.func @transform_4(%arg0: i32, %arg1: i32) -> (i32, i32) {
    %c0_i32 = arith.constant 0 : i32
    %c0_i32_0 = arith.constant 0 : i32
    %c0_i32_1 = arith.constant 0 : i32
    return %c0_i32, %c0_i32_0 : i32, i32
  }
  func.func @transform_5(%arg0: i32, %arg1: i32) -> (i32, i32) {
    %c0_i32 = arith.constant 0 : i32
    %c0_i32_0 = arith.constant 0 : i32
    return %c0_i32, %arg1 : i32, i32
  }
  func.func @transform_6(%arg0: i32, %arg1: i32) -> (i32, i32) {
    %c0_i32 = arith.constant 0 : i32
    %c0_i32_0 = arith.constant 0 : i32
    return %c0_i32, %arg1 : i32, i32
  }
  func.func @transform_7(%arg0: i32, %arg1: i32) -> (i32, i32) {
    %c0_i32 = arith.constant 0 : i32
    %c0_i32_0 = arith.constant 0 : i32
    return %arg0, %c0_i32 : i32, i32
  }
  func.func @transform_8(%arg0: i32, %arg1: i32) -> (i32, i32) {
    %c0_i32 = arith.constant 0 : i32
    return %arg0, %arg1 : i32, i32
  }
}

</mosaic_0001>

<bundles_post_ra>
// kernel: tpu_custom_call.1
= control target key start
LH: loop header
LB: loop body
LE: loop exit
PB: predicated region body
PF: predicated region fallthrough
CT: control target
= control target key end

     0   :  { %14 = vsyncpa [#allocation4], 0  ;;  %s773_s0 = inlined_call_operand.hbm [shape: f32[16,128], index: 0, kind: input, shape index: {}]   ;;  %s774_s1 = inlined_call_operand.hbm [shape: f32[128,128], index: 1, kind: input, shape index: {}]   ;;  %s775_s2 = inlined_call_operand.vmem [shape: f32[1,128], index: 2, kind: input, shape index: {}]   ;;  %s776_s3 = inlined_call_operand.hbm [shape: f32[1,128], index: 3, kind: input, shape index: {}]   ;;  %s777_s4 = inlined_call_operand.hbm [shape: f32[1,128], index: 4, kind: input, shape index: {}]   ;;  %s778_s5 = inlined_call_operand.hbm [shape: f32[128,256], index: 5, kind: input, shape index: {}]   ;;  %s779_s6 = inlined_call_operand.vmem [shape: f32[1,256], index: 6, kind: input, shape index: {}]   ;;  %s780_s7 = inlined_call_operand.hbm [shape: f32[16,128], index: 7, kind: output, shape index: {0}]   ;;  %s781_s8 = inlined_call_operand.hbm [shape: f32[16,256], index: 8, kind: output, shape index: {1}]  }
   0x1   :  { %15 = vsyncpa [#allocation7], 0 }
   0x2   :  { %16 = vsyncpa [#allocation10], 0 }
   0x3   :  { %17 = vsyncpa [#allocation5], 0 }
   0x4   :  { %18 = vsyncpa [#allocation14], 0  ;;  %s36_s29 = sshll.u32 %s774_s1, 4  ;;  %s650_s30 = smov [#allocation6]   ;;  %s37_s29 = int_to_ptr.hbm [resolvable:$true] %s36_s29 }
   0x5   :  { %s38_s9 = sshll.u32 %s650_s30, 4  ;;  %s63_s12 = sshll.u32 %s777_s4, 4  ;;  %s39_s9 = int_to_ptr.vmem [resolvable:$true] %s38_s9  ;;  %s64_s12 = int_to_ptr.hbm [resolvable:$true] %s63_s12 }
   0x6   :  { %s651_s13 = smov 128   ;;  %s652_s14 = smov 8  }
   0x7   :  { %44 = dma.hbm_to_vmem [thread:$0]  %s37_s29, 2048, %s39_s9, [#allocation7], %s651_s13, %s651_s13, %s652_s14  }
   0x8   :  { %s653_s15 = smov [#allocation9]   ;;  %s23_s1 = sshll.u32 %s773_s0, 4  ;;  %s24_s1 = int_to_ptr.hbm [resolvable:$true] %s23_s1 }
   0x9   :  { %s65_s16 = sshll.u32 %s653_s15, 4  ;;  %s52_s4 = sshll.u32 %s776_s3, 4  ;;  %s66_s16 = int_to_ptr.vmem [resolvable:$true] %s65_s16  ;;  %s53_s4 = int_to_ptr.hbm [resolvable:$true] %s52_s4 }
   0xa   :  { %68 = dma.hbm_to_vmem [thread:$0]  %s64_s12, 16, %s66_s16, [#allocation10]  }
   0xb   :  { %s654_s21 = smov [#allocation3]   ;;  %s655_s23 = smov [#allocation8]  }
   0xc   :  { %s25_s22 = sshll.u32 %s654_s21, 4  ;;  %s54_s24 = sshll.u32 %s655_s23, 4  ;;  %s26_s22 = int_to_ptr.vmem [resolvable:$true] %s25_s22  ;;  %s55_s24 = int_to_ptr.vmem [resolvable:$true] %s54_s24 }
   0xd   :  { %31 = dma.hbm_to_vmem [thread:$0]  %s24_s1, 256, %s26_s22, [#allocation4], %s651_s13, %s651_s13, %s652_s14  }
   0xe   :  { %s73_s0 = sshll.u32 %s778_s5, 4  ;;  %s656_s27 = smov [#allocation11]   ;;  %s74_s0 = int_to_ptr.hbm [resolvable:$true] %s73_s0 }
   0xf   :  { %57 = dma.hbm_to_vmem [thread:$0]  %s53_s4, 16, %s55_s24, [#allocation7]  }
  0x10   :  { %s75_s28 = sshll.u32 %s656_s27, 4  ;;  %s657_s3 = smov 256   ;;  %s76_s28 = int_to_ptr.vmem [resolvable:$true] %s75_s28 }
  0x11   :  { %s658_s29 = smov 16  }
  0x12   :  { %81 = dma.hbm_to_vmem [thread:$0]  %s74_s0, 4096, %s76_s28, [#allocation10], %s657_s3, %s657_s3, %s658_s29  }
  0x13   :  { %640 = dma.done.wait [#allocation4], 256  }
  0x14   :  { %641 = vsyncadd [#allocation4], 4294967040 }
  0x15   :  { %642 = dma.done.wait [#allocation7], 2064  }
  0x16   :  { %643 = vsyncadd [#allocation7], 4294965232 }
  0x17   :  { %644 = dma.done.wait [#allocation10], 4112  }
  0x18   :  { %645 = vsyncadd [#allocation10], 4294963184  ;;  %v125_v0 = vld [vmem:[#allocation6 + $0x78] sm:$0xff]  ;;  %v124_v1 = vld [vmem:[#allocation6 + $0x70] sm:$0xff]  ;;  %s399_s10 = sshll.u32 %s780_s7, 4  ;;  %s659_s11 = smov [#allocation12]   ;;  %s400_s10 = int_to_ptr.hbm [resolvable:$true] %s399_s10 }
  0x19   :  { %130 = vmatpush.msra.mxu0 %v125_v0  ;;  %434 = vmatpush.msra.mxu3 %v125_v0  ;;  %v123_v2 = vld [vmem:[#allocation6 + $0x68] sm:$0xff]  ;;  %v122_v3 = vld [vmem:[#allocation6 + $0x60] sm:$0xff]  ;;  %v121_v4 = vld [vmem:[#allocation6 + $0x58] sm:$0xff]  ;;  %s397_s12 = sshll.u32 %s659_s11, 4  ;;  %s660_s7 = smov [#allocation13]   ;;  %s398_s12 = int_to_ptr.vmem [resolvable:$true] %s397_s12 }
  0x1a   :  { %v120_v5 = vld [vmem:[#allocation6 + $0x50] sm:$0xff]  ;;  %v119_v6 = vld [vmem:[#allocation6 + $0x48] sm:$0xff]  ;;  %v118_v7 = vld [vmem:[#allocation6 + $0x40] sm:$0xff]  ;;  %s410_s17 = sshll.u32 %s660_s7, 4  ;;  %s411_s17 = int_to_ptr.vmem [resolvable:$true] %s410_s17 }
  0x1b   :  { %131 = vmatpush.msra.mxu0 %v124_v1  ;;  %435 = vmatpush.msra.mxu3 %v124_v1  ;;  %v117_v8 = vld [vmem:[#allocation6 + $0x38] sm:$0xff]  ;;  %v116_v9 = vld [vmem:[#allocation6 + $0x30] sm:$0xff]  ;;  %v115_v10 = vld [vmem:[#allocation6 + $0x28] sm:$0xff] }
  0x1c   :  { %v114_v11 = vld [vmem:[#allocation6 + $0x20] sm:$0xff]  ;;  %v113_v12 = vld [vmem:[#allocation6 + $0x18] sm:$0xff]  ;;  %v112_v13 = vld [vmem:[#allocation6 + $0x10] sm:$0xff] }
  0x1d   :  { %132 = vmatpush.msra.mxu0 %v123_v2  ;;  %436 = vmatpush.msra.mxu3 %v123_v2  ;;  %v111_v14 = vld [vmem:[#allocation6 + $0x8] sm:$0xff]  ;;  %v110_v15 = vld [vmem:[#allocation6] sm:$0xff]  ;;  %v108_v16 = vld [vmem:[#allocation3] sm:$0xff] }
  0x1e   :  { %v109_v17 = vld [vmem:[#allocation3 + $0x8] sm:$0xff]  ;;  %v461_v18 = vld [vmem:[%s775_s2] ss:$0 sm:$0xff] }
  0x1f   :  { %133 = vmatpush.msra.mxu0 %v122_v3  ;;  %437 = vmatpush.msra.mxu3 %v122_v3 }
  0x21   :  { %134 = vmatpush.msra.mxu0 %v121_v4  ;;  %438 = vmatpush.msra.mxu3 %v121_v4 }
  0x23   :  { %135 = vmatpush.msra.mxu0 %v120_v5  ;;  %439 = vmatpush.msra.mxu3 %v120_v5 }
  0x25   :  { %136 = vmatpush.msra.mxu0 %v119_v6  ;;  %440 = vmatpush.msra.mxu3 %v119_v6 }
  0x27   :  { %137 = vmatpush.msra.mxu0 %v118_v7  ;;  %441 = vmatpush.msra.mxu3 %v118_v7 }
  0x29   :  { %138 = vmatpush.msra.mxu0 %v117_v8  ;;  %442 = vmatpush.msra.mxu3 %v117_v8 }
  0x2b   :  { %139 = vmatpush.msra.mxu0 %v116_v9  ;;  %443 = vmatpush.msra.mxu3 %v116_v9 }
  0x2d   :  { %140 = vmatpush.msra.mxu0 %v115_v10  ;;  %444 = vmatpush.msra.mxu3 %v115_v10 }
  0x2f   :  { %141 = vmatpush.msra.mxu0 %v114_v11  ;;  %445 = vmatpush.msra.mxu3 %v114_v11 }
  0x31   :  { %142 = vmatpush.msra.mxu0 %v113_v12  ;;  %446 = vmatpush.msra.mxu3 %v113_v12 }
  0x33   :  { %143 = vmatpush.msra.mxu0 %v112_v13  ;;  %447 = vmatpush.msra.mxu3 %v112_v13 }
  0x35   :  { %144 = vmatpush.msra.mxu0 %v111_v14  ;;  %448 = vmatpush.msra.mxu3 %v111_v14 }
  0x37   :  { %145 = vmatpush.msra.mxu0 %v110_v15  ;;  %449 = vmatpush.msra.mxu3 %v110_v15 }
  0x38   :  { %146 = vmatmul.f32.vlgmr.msra.gmra.mxu0 %v108_v16  ;;  %149 = vmatmul.f32.vlgmr.msra.gmra.mxu3 %v109_v17 }
  0xb5   :  { %v147_v19 = vpop.f32.mrf.mxu0 }
  0xb6   :  { %v733_v20 = vadd.f32 %v461_v18, %v147_v19 }
  0xb8   :  { %v155_v21 = vmul.f32 0.70710677, %v733_v20 }
  0xba   :  { %v157_v22 = vmul.f32 %v155_v21, %v155_v21 }
  0xbb   :  { %v150_v23 = vpop.f32.mrf.mxu3 }
  0xbc   :  { %v158_v24 = vmin.f32 %v157_v22, 16.0  ;;  %v736_v25 = vadd.f32 %v461_v18, %v150_v23 }
  0xbe   :  { %v159_v26 = vmul.f32 2.1237322e-06, %v158_v24  ;;  %v170_v27 = vmul.f32 3.8918573e-05, %v158_v24  ;;  %v739_v28 = vmul.f32 0.70710677, %v736_v25 }
  0xc0   :  { %v160_v29 = vadd.f32 0.00028619796, %v159_v26  ;;  %v171_v30 = vadd.f32 0.001143296, %v170_v27  ;;  %v197_v31 = vmul.f32 %v739_v28, %v739_v28 }
  0xc2   :  { %v161_v32 = vmul.f32 %v160_v29, %v158_v24  ;;  %v172_v33 = vmul.f32 %v171_v30, %v158_v24  ;;  %v198_v34 = vmin.f32 %v197_v31, 16.0  ;;  %v153_v29 = vmul.f32 0.5, %v733_v20 }
  0xc4   :  { %v173_v35 = vadd.f32 0.014752088, %v172_v33  ;;  %v162_v36 = vadd.f32 0.0036580483, %v161_v32  ;;  %v199_v37 = vmul.f32 2.1237322e-06, %v198_v34 }
  0xc5   :  { %v210_v38 = vmul.f32 3.8918573e-05, %v198_v34 }
  0xc6   :  { %v174_v39 = vmul.f32 %v173_v35, %v158_v24  ;;  %v200_v40 = vadd.f32 0.00028619796, %v199_v37  ;;  %v163_v43 = vmul.f32 %v162_v36, %v158_v24  ;;  %v154_v37 = vmul.f32 0.5, %v736_v25  ;;  %v331_v25 = vld [vmem:[#allocation11 + $0xd0] sm:$0xff] }
  0xc7   :  { %v211_v41 = vadd.f32 0.001143296, %v210_v38 }
  0xc8   :  { %v175_v42 = vadd.f32 0.112945676, %v174_v39  ;;  %v201_v44 = vmul.f32 %v200_v40, %v198_v34  ;;  %v164_v50 = vadd.f32 0.05243302, %v163_v43  ;;  %v335_v40 = vld [vmem:[#allocation11 + $0xf0] sm:$0xff]  ;;  %v334_v43 = vld [vmem:[#allocation11 + $0xe8] sm:$0xff] }
  0xc9   :  { %v212_v45 = vmul.f32 %v211_v41, %v198_v34  ;;  %v336_v41 = vld [vmem:[#allocation11 + $0xf8] sm:$0xff]  ;;  %343 = vmatpush.msra.mxu1 %v335_v40 }
  0xca   :  { %v176_v46 = vmul.f32 %v175_v42, %v158_v24  ;;  %v202_v49 = vadd.f32 0.0036580483, %v201_v44  ;;  %v165_v56 = vmul.f32 %v164_v50, %v158_v24  ;;  %366 = vmatpush.msra.mxu2 %v336_v41  ;;  %v333_v42 = vld [vmem:[#allocation11 + $0xe0] sm:$0xff]  ;;  %v332_v44 = vld [vmem:[#allocation11 + $0xd8] sm:$0xff]  ;;  %v326_v50 = vld [vmem:[#allocation11 + $0xa8] sm:$0xff] }
  0xcb   :  { %v213_v47 = vadd.f32 0.014752088, %v212_v45  ;;  %344 = vmatpush.msra.mxu1 %v333_v42  ;;  %v329_v45 = vld [vmem:[#allocation11 + $0xc0] sm:$0xff]  ;;  %v463_v40 = vld [vmem:[#allocation9] ss:$0 sm:$0xff] }
  0xcc   :  { %v177_v48 = vadd.f32 0.4994258, %v176_v46  ;;  %v203_v55 = vmul.f32 %v202_v49, %v198_v34  ;;  %v166_v60 = vadd.f32 0.18741608, %v165_v56  ;;  %367 = vmatpush.msra.mxu2 %v334_v43  ;;  %v330_v46 = vld [vmem:[#allocation11 + $0xc8] sm:$0xff]  ;;  %v325_v49 = vld [vmem:[#allocation11 + $0xa0] sm:$0xff] }
  0xcd   :  { %v214_v51 = vmul.f32 %v213_v47, %v198_v34  ;;  %345 = vmatpush.msra.mxu1 %v331_v25  ;;  %v327_v47 = vld [vmem:[#allocation11 + $0xb0] sm:$0xff]  ;;  %v320_v56 = vld [vmem:[#allocation11 + $0x78] sm:$0xff] }
  0xce   :  { %v178_v52 = vmul.f32 %v177_v48, %v158_v24  ;;  %v204_v59 = vadd.f32 0.05243302, %v203_v55  ;;  %v167_v1 = vmul.f32 %v166_v60, %v158_v24  ;;  %368 = vmatpush.msra.mxu2 %v332_v44  ;;  %v328_v48 = vld [vmem:[#allocation11 + $0xb8] sm:$0xff]  ;;  %v319_v55 = vld [vmem:[#allocation11 + $0x70] sm:$0xff] }
  0xcf   :  { %v215_v53 = vadd.f32 0.112945676, %v214_v51  ;;  %346 = vmatpush.msra.mxu1 %v329_v45  ;;  %v323_v51 = vld [vmem:[#allocation11 + $0x90] sm:$0xff]  ;;  %v316_v60 = vld [vmem:[#allocation11 + $0x58] sm:$0xff] }
  0xd0   :  { %v179_v54 = vadd.f32 1.0, %v178_v52  ;;  %v205_v0 = vmul.f32 %v204_v59, %v198_v34  ;;  %v168_v6 = vadd.f32 1.1283791, %v167_v1  ;;  %369 = vmatpush.msra.mxu2 %v330_v46  ;;  %v324_v52 = vld [vmem:[#allocation11 + $0x98] sm:$0xff]  ;;  %v315_v59 = vld [vmem:[#allocation11 + $0x50] sm:$0xff] }
  0xd1   :  { %v216_v57 = vmul.f32 %v215_v53, %v198_v34  ;;  %347 = vmatpush.msra.mxu1 %v327_v47  ;;  %v321_v53 = vld [vmem:[#allocation11 + $0x80] sm:$0xff]  ;;  %v312_v1 = vld [vmem:[#allocation11 + $0x38] sm:$0xff] }
  0xd2   :  { %464 = vrcp.f32 %v179_v54  ;;  %v191_v4 = vand.u32 2147483648, %v179_v54  ;;  %v206_v5 = vadd.f32 0.18741608, %v205_v0  ;;  %v189_v8 = vand.u32 2147483647, %v179_v54  ;;  %370 = vmatpush.msra.mxu2 %v328_v48  ;;  %v311_v0 = vld [vmem:[#allocation11 + $0x30] sm:$0xff] }
  0xd3   :  { %v217_v58 = vadd.f32 0.4994258, %v216_v57  ;;  %vm185_vm1 = vweird.f32 %v179_v54  ;;  %v169_v14 = vmul.f32 %v168_v6, %v155_v21  ;;  %348 = vmatpush.msra.mxu1 %v325_v49  ;;  %v317_v57 = vld [vmem:[#allocation11 + $0x60] sm:$0xff]  ;;  %v307_v6 = vld [vmem:[#allocation11 + $0x10] sm:$0xff] }
  0xd4   :  { %v192_v11 = vor.u32 1.1754944e-38, %v191_v4  ;;  %v207_v12 = vmul.f32 %v206_v5, %v198_v34  ;;  %vm190_vm3 = vcmp.eq.f32.partialorder %v189_v8, 8.507059e+37  ;;  %371 = vmatpush.msra.mxu2 %v326_v50  ;;  %v310_v4 = vld [vmem:[#allocation11 + $0x28] sm:$0xff]  ;;  %v305_v8 = vld [vmem:[#allocation11] sm:$0xff] }
  0xd5   :  { %v218_v61 = vmul.f32 %v217_v58, %v198_v34  ;;  %349 = vmatpush.msra.mxu1 %v323_v51  ;;  %v318_v58 = vld [vmem:[#allocation11 + $0x68] sm:$0xff] }
  0xd6   :  { %v208_v22 = vadd.f32 1.1283791, %v207_v12  ;;  %372 = vmatpush.msra.mxu2 %v324_v52 }
  0xd7   :  { %v219_v62 = vadd.f32 1.0, %v218_v61  ;;  %350 = vmatpush.msra.mxu1 %v321_v53 }
  0xd8   :  { %v465_v63 = vpop.eup %464  ;;  %v209_v21 = vmul.f32 %v208_v22, %v739_v28 }
  0xd9   :  { %v181_v2 = vmul.f32 %v465_v63, %v179_v54  ;;  %466 = vrcp.f32 %v219_v62  ;;  %vm186_vm0 = vweird.f32 %v465_v63  ;;  %v231_v19 = vand.u32 2147483648, %v219_v62  ;;  %v322_v54 = vld [vmem:[#allocation11 + $0x88] sm:$0xff]  ;;  %351 = vmatpush.msra.mxu1 %v319_v55 }
  0xda   :  { %vm187_vm2 = vmor %vm185_vm1, %vm186_vm0  ;;  %v229_v24 = vand.u32 2147483647, %v219_v62  ;;  %vm225_vm5 = vweird.f32 %v219_v62  ;;  %373 = vmatpush.msra.mxu2 %v322_v54 }
  0xdb   :  { %v182_v3 = vsub.f32 1.0, %v181_v2  ;;  %v232_v30 = vor.u32 1.1754944e-38, %v231_v19  ;;  %352 = vmatpush.msra.mxu1 %v317_v57 }
  0xdc   :  { %vm230_vm7 = vcmp.eq.f32.partialorder %v229_v24, 8.507059e+37  ;;  %374 = vmatpush.msra.mxu2 %v320_v56 }
  0xdd   :  { %v183_v7 = vmul.f32 %v465_v63, %v182_v3  ;;  %353 = vmatpush.msra.mxu1 %v315_v59  ;;  %v309_v3 = vld [vmem:[#allocation11 + $0x20] sm:$0xff] }
  0xde   :  { %375 = vmatpush.msra.mxu2 %v318_v58 }
  0xdf   :  { %v467_v9 = vpop.eup %466  ;;  %v184_v10 = vadd.f32 %v465_v63, %v183_v7  ;;  %v308_v7 = vld [vmem:[#allocation11 + $0x18] sm:$0xff] }
  0xe0   :  { %v221_v13 = vmul.f32 %v467_v9, %v219_v62  ;;  %vm226_vm4 = vweird.f32 %v467_v9  ;;  %376 = vmatpush.msra.mxu2 %v316_v60  ;;  %v313_v62 = vld [vmem:[#allocation11 + $0x40] sm:$0xff] }
  0xe1   :  { %v188_v15 = vsel %vm187_vm2, %v465_v63, %v184_v10  ;;  %vm227_vm6 = vmor %vm225_vm5, %vm226_vm4  ;;  %v314_v63 = vld [vmem:[#allocation11 + $0x48] sm:$0xff]  ;;  %354 = vmatpush.msra.mxu1 %v313_v62 }
  0xe2   :  { %v193_v16 = vsel %vm190_vm3, %v192_v11, %v188_v15  ;;  %v222_v17 = vsub.f32 1.0, %v221_v13  ;;  %377 = vmatpush.msra.mxu2 %v314_v63  ;;  %v306_v10 = vld [vmem:[#allocation11 + $0x8] sm:$0xff] }
  0xe3   :  { %v194_v18 = vmul.f32 %v193_v16, %v169_v14  ;;  %355 = vmatpush.msra.mxu1 %v311_v0 }
  0xe4   :  { %v223_v23 = vmul.f32 %v467_v9, %v222_v17  ;;  %378 = vmatpush.msra.mxu2 %v312_v1 }
  0xe5   :  { %v432_v26 = vclamps-f32 %v194_v18, 1.0  ;;  %356 = vmatpush.msra.mxu1 %v309_v3 }
  0xe6   :  { %v224_v27 = vadd.f32 %v467_v9, %v223_v23  ;;  %379 = vmatpush.msra.mxu2 %v310_v4 }
  0xe7   :  { %v237_v31 = vadd.f32 1.0, %v432_v26  ;;  %357 = vmatpush.msra.mxu1 %v307_v6 }
  0xe8   :  { %v228_v32 = vsel %vm227_vm6, %v467_v9, %v224_v27  ;;  %380 = vmatpush.msra.mxu2 %v308_v7 }
  0xe9   :  { %v233_v33 = vsel %vm230_vm7, %v232_v30, %v228_v32  ;;  %v745_v34 = vmul.f32 %v237_v31, %v153_v29  ;;  %358 = vmatpush.msra.mxu1 %v305_v8 }
  0xea   :  { %v234_v35 = vmul.f32 %v233_v33, %v209_v21  ;;  %381 = vmatpush.msra.mxu2 %v306_v10 }
  0xeb   :  { %241 = vadd.xlane.f32.xlu0 %v745_v34  ;;  %v245_v20 = vmul.f32 %v745_v34, %v745_v34 }
  0xec   :  { %v433_v36 = vclamps-f32 %v234_v35, 1.0 }
  0xee   :  { %v238_v38 = vadd.f32 1.0, %v433_v36 }
  0xf0   :  { %v749_v39 = vmul.f32 %v238_v38, %v154_v37  ;;  %v462_v37 = vld [vmem:[#allocation8] ss:$0 sm:$0xff] }
  0xf2   :  { %243 = vadd.xlane.f32.xlu1 %v749_v39  ;;  %v246_v28 = vmul.f32 %v749_v39, %v749_v39 }
  0xf3   :  { %247 = vadd.xlane.f32.xlu0 %v245_v20 }
  0xfa   :  { %249 = vadd.xlane.f32.xlu1 %v246_v28 }
 0x15e   :  { %v242_v61 = vpop.xlane.xlu0 %241 }
 0x15f   :  { %v251_v2 = vmul.f32 0.0078125, %v242_v61 }
 0x161   :  { %v255_v11 = vmul.f32 %v251_v2, %v251_v2  ;;  %v261_v35 = vsub.f32 %v745_v34, %v251_v2 }
 0x165   :  { %v244_v5 = vpop.xlane.xlu1 %243 }
 0x166   :  { %v248_v9 = vpop.xlane.xlu0 %247  ;;  %v252_v14 = vmul.f32 0.0078125, %v244_v5 }
 0x167   :  { %v253_v12 = vmul.f32 0.0078125, %v248_v9 }
 0x168   :  { %v256_v18 = vmul.f32 %v252_v14, %v252_v14  ;;  %v262_v44 = vsub.f32 %v749_v39, %v252_v14  ;;  %v337_v39 = vld [vmem:[%s779_s6] sm:$0x3] }
 0x169   :  { %v257_v13 = vsub.f32 %v253_v12, %v255_v11  ;;  %v339_v48 = vperm.slane %v337_v39, 0  ;;  %v340_v51 = vperm.slane %v337_v39, 1 }
 0x16b   :  { %v259_v15 = vmax.f32 %v257_v13, 0.0 }
 0x16d   :  { %v263_v16 = vadd.f32 1e-12, %v259_v15  ;;  %v250_v17 = vpop.xlane.xlu1 %249 }
 0x16e   :  { %v254_v19 = vmul.f32 0.0078125, %v250_v17 }
 0x16f   :  { %468 = vrsqrt.f32 %v263_v16  ;;  %vm271_vm9 = vweird.f32 %v263_v16 }
 0x170   :  { %v258_v22 = vsub.f32 %v254_v19, %v256_v18 }
 0x172   :  { %v260_v23 = vmax.f32 %v258_v22, 0.0 }
 0x174   :  { %v264_v24 = vadd.f32 1e-12, %v260_v23 }
 0x175   :  { %v469_v26 = vpop.eup %468 }
 0x176   :  { %v266_v27 = vmul.f32 %v469_v26, %v263_v16  ;;  %470 = vrsqrt.f32 %v264_v24  ;;  %vm272_vm8 = vweird.f32 %v469_v26  ;;  %vm281_vm12 = vweird.f32 %v264_v24 }
 0x177   :  { %vm273_vm10 = vmor %vm271_vm9, %vm272_vm8 }
 0x178   :  { %v267_v29 = vmul.f32 %v469_v26, %v266_v27 }
 0x17a   :  { %v268_v30 = vmul.f32 0.5, %v267_v29 }
 0x17c   :  { %v471_v31 = vpop.eup %470  ;;  %v269_v21 = vsub.f32 1.5, %v268_v30 }
 0x17d   :  { %v276_v32 = vmul.f32 %v471_v31, %v264_v24  ;;  %vm282_vm11 = vweird.f32 %v471_v31 }
 0x17e   :  { %v270_v33 = vmul.f32 %v469_v26, %v269_v21  ;;  %vm283_vm13 = vmor %vm281_vm12, %vm282_vm11 }
 0x17f   :  { %v277_v36 = vmul.f32 %v471_v31, %v276_v32 }
 0x180   :  { %v274_v38 = vsel %vm273_vm10, %v469_v26, %v270_v33 }
 0x181   :  { %v278_v20 = vmul.f32 0.5, %v277_v36  ;;  %v285_v28 = vmul.f32 %v274_v38, %v261_v35 }
 0x183   :  { %v279_v41 = vsub.f32 1.5, %v278_v20  ;;  %v291_v42 = vmul.f32 %v462_v37, %v285_v28 }
 0x185   :  { %v280_v43 = vmul.f32 %v471_v31, %v279_v41  ;;  %v297_v25 = vadd.f32 %v463_v40, %v291_v42 }
 0x187   :  { %359 = vmatmul.f32.vlgmr.msra.gmra.mxu1 %v297_v25  ;;  %301 = vst [vmem:[#allocation12] sm:$0xff] %v297_v25  ;;  %382 = vmatmul.f32.vlgmr.msra.gmra.mxu2 %v297_v25  ;;  %v284_v34 = vsel %vm283_vm13, %v471_v31, %v280_v43 }
 0x188   :  { %v286_v45 = vmul.f32 %v284_v34, %v262_v44 }
 0x18a   :  { %v292_v46 = vmul.f32 %v462_v37, %v286_v45 }
 0x18c   :  { %v298_v47 = vadd.f32 %v463_v40, %v292_v46 }
 0x18e   :  { %302 = vst [vmem:[#allocation12 + $0x8] sm:$0xff] %v298_v47 }
 0x18f   :  { %362 = vmatmul.f32.gmra.mxu1 %v298_v47  ;;  %385 = vmatmul.f32.gmra.mxu2 %v298_v47  ;;  %405 = dma.vmem_to_hbm [thread:$0]  %s398_s12, 256, %s400_s10, [#allocation5], %s651_s13, %s651_s13, %s652_s14  }
 0x190   :  { %s412_s13 = sshll.u32 %s781_s8, 4  ;;  %s413_s13 = int_to_ptr.hbm [resolvable:$true] %s412_s13 }
 0x204   :  { %v360_v49 = vpop.f32.mrf.mxu1 }
 0x205   :  { %v361_v50 = vadd.f32 %v360_v49, %v339_v48 }
 0x207   :  { %389 = vst [vmem:[#allocation13] sm:$0xff] %v361_v50 }
 0x20a   :  { %v383_v52 = vpop.f32.mrf.mxu2 }
 0x20b   :  { %v384_v53 = vadd.f32 %v383_v52, %v340_v51 }
 0x20c   :  { %v363_v54 = vpop.f32.mrf.mxu1 }
 0x20d   :  { %390 = vst [vmem:[#allocation13 + $0x8] sm:$0xff] %v384_v53  ;;  %v364_v55 = vadd.f32 %v363_v54, %v339_v48 }
 0x20f   :  { %391 = vst [vmem:[#allocation13 + $0x10] sm:$0xff] %v364_v55 }
 0x212   :  { %v386_v56 = vpop.f32.mrf.mxu2 }
 0x213   :  { %v387_v57 = vadd.f32 %v386_v56, %v340_v51 }
 0x215   :  { %392 = vst [vmem:[#allocation13 + $0x18] sm:$0xff] %v387_v57 }
 0x216   :  { %418 = dma.vmem_to_hbm [thread:$0]  %s411_s17, 512, %s413_s13, [#allocation14], %s657_s3, %s657_s3, %s658_s29  }
 0x217   :  { %646 = dma.done.wait [#allocation5], 256  }
 0x218   :  { %647 = vsyncadd [#allocation5], 4294967040 }
 0x219   :  { %648 = dma.done.wait [#allocation14], 512  }
 0x21a   :  { %649 = vsyncadd [#allocation14], 4294966784 }
 0x21b   :  { %427 = vsyncpa [#allocation4], 1 }
 0x21c   :  { %428 = vsyncpa [#allocation7], 1 }
 0x21d   :  { %429 = vsyncpa [#allocation10], 1 }
 0x21e   :  { %430 = vsyncpa [#allocation5], 1 }
 0x21f   :  { %431 = vsyncpa [#allocation14], 1 }

</bundles_post_ra>
